<compile_context>
chip_gen: v7x
topology: tpu7x:2x2x1
jax: 0.10.0
libtpu: 0.0.40
codegen_flags: <defaults>
</compile_context>

<pallas_src>
import math

import jax
import jax.numpy as jnp
from jax import lax
from jax.experimental import pallas as pl
from jax.experimental.pallas import tpu as pltpu


def _round_up(v, m):
    return ((v + m - 1) // m) * m


def _nbytes(shape, dt):
    return math.prod(shape) * jnp.dtype(dt).itemsize


def _lora_linear_kernel(x_ref, w_ref, bias_ref, a_ref, bt_ref, o_ref, ax_ref):
    # x_ref    : (TM, IN)  activation row tile (same block for every j -> DMA'd once per i)
    # w_ref    : (TN, IN)  base-weight column panel, nn.Linear layout (no HBM transpose)
    # bias_ref : (1, TN)   bias panel
    # a_ref    : (R, IN)   LoRA down-proj, pre-scaled by alpha/rank (grid-invariant)
    # bt_ref   : (R, TN)   LoRA up-proj, transposed once in the wrapper (lane-dense)
    # o_ref    : (TM, TN)  output tile
    # ax_ref   : (TM, R)   f32 scratch holding the hoisted down-projection
    contract_last = (((1,), (1,)), ((), ()))  # contract last dim of both operands

    # Hoisted LoRA down-projection: only on the first column panel of each row
    # tile (j is the innermost, sequential "arbitrary" grid axis), reused for
    # all remaining panels of the same row tile.
    @pl.when(pl.program_id(1) == 0)
    def _():
        ax_ref[...] = lax.dot_general(
            x_ref[...], a_ref[...], dimension_numbers=contract_last,
            preferred_element_type=jnp.float32)

    # Base projection: (TM, IN) x (TN, IN)^T -> (TM, TN), f32 accumulation on MXU.
    base = lax.dot_general(x_ref[...], w_ref[...], dimension_numbers=contract_last,
                           preferred_element_type=jnp.float32)

    # LoRA up-projection: (TM, R) x (R, TN) -> (TM, TN).
    lora = lax.dot_general(
        ax_ref[...].astype(bt_ref.dtype), bt_ref[...],
        dimension_numbers=(((1,), (0,)), ((), ())),
        preferred_element_type=jnp.float32)

    # Epilogue kept in f32 before the final cast.
    o_ref[...] = (base + bias_ref[...].astype(jnp.float32) + lora).astype(o_ref.dtype)


def _pick_tile_n(out_features, want):
    """Lane-dense column-panel width. Prefer a tile that divides out_features so
    the base weight never has to be re-padded (full HBM copy) per call."""
    if out_features <= want:
        return out_features, out_features            # full dim: no padding at all
    t = max(128, (want // 128) * 128)
    cand = t
    while cand >= 128:
        if out_features % cand == 0:
            return cand, out_features                # exact divisor: no padding
        cand -= 128
    # TODO(synk): for out_features with no multiple-of-128 divisor <= want,
    # pad W/bias/B once at parameter-load time instead of per forward call.
    return t, _round_up(out_features, t)


def lora_linear(x, w, bias, a, b, *, alpha, rank, tile_m=512, tile_n=256):
    """Pallas LoRA linear forward.

    x    : [..., in_features]
    w    : [out_features, in_features]  (PyTorch nn.Linear layout)
    bias : [out_features]
    a    : [rank, in_features]          (LoRA down-proj, nn.Linear layout)
    b    : [out_features, rank]         (LoRA up-proj,  nn.Linear layout)
    """
    scaling = alpha / rank
    out_features, in_features = w.shape
    r = a.shape[0]

    lead_shape = x.shape[:-1]
    x2d = x.reshape(-1, in_features)
    m = x2d.shape[0]

    # Fold alpha/rank into A once (equivalent to scaling after the up-proj) and
    # transpose B once to (R, OUT) so its panels are lane-dense.
    a_s = (a * scaling).astype(a.dtype)
    bt = b.T  # (R, OUT)

    # Sublane packing floor for the row tile: 8 for f32, 16 for bf16, 32 for i8/fp8.
    sub = max(8, 32 // jnp.dtype(x.dtype).itemsize)

    # Row tiling: large tiles amortize the streaming of W (HBM traffic for W
    # scales with M / tile_m). Padded rows are bias-only and sliced off.
    if m <= tile_m:
        tm = m
    else:
        tm = max(sub, (tile_m // sub) * sub)

    tn, n_pad = _pick_tile_n(out_features, tile_n)

    # VMEM-aware plan: query per-core VMEM (64 MiB v7x, 128 MiB v5e/v6e) and
    # shrink tiles if the double-buffered plan does not fit.
    try:
        vmem_cap = int(pltpu.get_tpu_info().vmem_capacity_bytes)
    except Exception:
        vmem_cap = 64 << 20  # conservative (v7x per-TC)
    budget = int(vmem_cap * 0.85)

    def plan_bytes(tm_, tn_):
        return (2 * (_nbytes((tm_, in_features), x2d.dtype)
                     + _nbytes((tn_, in_features), w.dtype)
                     + _nbytes((1, tn_), bias.dtype)
                     + _nbytes((r, in_features), a_s.dtype)
                     + _nbytes((r, tn_), bt.dtype)
                     + _nbytes((tm_, tn_), x.dtype))
                + _nbytes((tm_, r), jnp.float32))

    while plan_bytes(tm, tn) > budget:
        if tm > sub:
            tm = max(sub, ((tm // 2) // sub) * sub)
        elif tn > 128:
            tn, n_pad = _pick_tile_n(out_features, max(128, tn // 2))
        else:
            # TODO(synk): add a K (in_features) grid axis with an f32 accumulator
            # for extreme in_features; rely on the compiler's scoped VMEM here.
            break

    m_pad = _round_up(m, tm)
    if m_pad != m:
        x2d = jnp.pad(x2d, ((0, m_pad - m), (0, 0)))
    if n_pad != out_features:
        w_p = jnp.pad(w, ((0, n_pad - out_features), (0, 0)))
        bt_p = jnp.pad(bt, ((0, 0), (0, n_pad - out_features)))
        bias_p = jnp.pad(bias, (0, n_pad - out_features))
    else:
        w_p, bt_p, bias_p = w, bt, bias
    bias2d = bias_p.reshape(1, n_pad)

    grid = (m_pad // tm, n_pad // tn)
    vmem_limit = int(max(32 << 20, min(plan_bytes(tm, tn) + (8 << 20), budget)))

    out = pl.pallas_call(
        _lora_linear_kernel,
        out_shape=jax.ShapeDtypeStruct((m_pad, n_pad), x.dtype),
        grid_spec=pltpu.PrefetchScalarGridSpec(
            num_scalar_prefetch=0,
            grid=grid,
            in_specs=[
                pl.BlockSpec((tm, in_features), lambda i, j: (i, 0)),   # x rows (reused over j)
                pl.BlockSpec((tn, in_features), lambda i, j: (j, 0)),   # W column panel
                pl.BlockSpec((1, tn), lambda i, j: (0, j)),             # bias panel
                pl.BlockSpec((r, in_features), lambda i, j: (0, 0)),    # A (grid-invariant)
                pl.BlockSpec((r, tn), lambda i, j: (0, j)),             # B^T panel (lane-dense)
            ],
            out_specs=pl.BlockSpec((tm, tn), lambda i, j: (i, j)),
            scratch_shapes=[pltpu.VMEM((tm, r), jnp.float32)],          # hoisted x @ A^T
        ),
        compiler_params=pltpu.CompilerParams(
            # j must be sequential ("arbitrary") so the down-projection computed
            # at j == 0 stays valid for the remaining panels of the same row
            # tile; megacore splits the row (i) axis.
            dimension_semantics=("parallel", "arbitrary"),
            vmem_limit_bytes=vmem_limit,
        ),
    )(x2d, w_p, bias2d, a_s, bt_p)

    out = out[:m, :out_features]
    return out.reshape(*lead_shape, out_features)


if __name__ == "__main__":
    # Small shapes implied by the module: a Linear layer applied to
    # [batch, seq, hidden] activations.
    batch, seq = 2, 8
    in_features, out_features = 32, 64
    rank, alpha = 4, 8.0

    key = jax.random.PRNGKey(0)
    kx, kw, kb, ka, kbb = jax.random.split(key, 5)

    x = jax.random.normal(kx, (batch, seq, in_features), dtype=jnp.float32)

    # Deterministic parameter init (mimicking nn.Linear uniform bounds).
    w_bound = 1.0 / math.sqrt(in_features)
    w = jax.random.uniform(kw, (out_features, in_features),
                           minval=-w_bound, maxval=w_bound, dtype=jnp.float32)
    bias = jax.random.uniform(kb, (out_features,),
                              minval=-w_bound, maxval=w_bound, dtype=jnp.float32)
    a = jax.random.uniform(ka, (rank, in_features),
                           minval=-w_bound, maxval=w_bound, dtype=jnp.float32)
    b_bound = 1.0 / math.sqrt(rank)
    b = jax.random.uniform(kbb, (out_features, rank),
                           minval=-b_bound, maxval=b_bound, dtype=jnp.float32)

    out = lora_linear(x, w, bias, a, b, alpha=alpha, rank=rank)
    out = jax.block_until_ready(out)

    # Pure-JAX reference matching the PyTorch forward.
    ref = (x @ w.T + bias) + ((x @ a.T) @ b.T) * (alpha / rank)
    assert out.shape == (batch, seq, out_features)
    assert jnp.allclose(out, ref, atol=1e-5, rtol=1e-5), "mismatch vs reference"

    print("KERNEL_OK")
</pallas_src>

<mosaic_0001>
module attributes {stable_mosaic.version = 11 : i64} {
  func.func @_lora_linear_kernel(%arg0: i32, %arg1: i32, %arg2: memref<16x32xf32, #tpu.memory_space<vmem>>, %arg3: memref<64x32xf32, #tpu.memory_space<vmem>>, %arg4: memref<1x64xf32, #tpu.memory_space<vmem>>, %arg5: memref<4x32xf32, #tpu.memory_space<vmem>>, %arg6: memref<4x64xf32, #tpu.memory_space<vmem>>, %arg7: memref<16x64xf32, #tpu.memory_space<vmem>>, %arg8: memref<16x4xf32, #tpu.memory_space<vmem>>) attributes {dimension_semantics = [#tpu.dimension_semantics<parallel>, #tpu.dimension_semantics<arbitrary>], iteration_bounds = array<i64: 1, 1>, scalar_prefetch = 0 : i64, scratch_operands = 1 : i64, tpu.core_type = #tpu.core_type<tc>, window_params = [{transform_indices = @transform_0, window_bounds = array<i64: 16, 32>}, {transform_indices = @transform_1, window_bounds = array<i64: 64, 32>}, {transform_indices = @transform_2, window_bounds = array<i64: 1, 64>}, {pipeline_mode = #tpu.pipeline_mode<synchronous>, transform_indices = @transform_3, window_bounds = array<i64: 4, 32>}, {transform_indices = @transform_4, window_bounds = array<i64: 4, 64>}, {transform_indices = @transform_5, window_bounds = array<i64: 16, 64>}]} {
    %c0_i32 = arith.constant 0 : i32
    %0 = arith.cmpi eq, %arg1, %c0_i32 : i32
    %1 = arith.extui %0 : i1 to i32
    %c0_i32_0 = arith.constant 0 : i32
    %2 = arith.cmpi ne, %1, %c0_i32_0 : i32
    scf.if %2 {
      %c0_13 = arith.constant 0 : index
      %c0_14 = arith.constant 0 : index
      %14 = vector.load %arg2[%c0_13, %c0_14] : memref<16x32xf32, #tpu.memory_space<vmem>>, vector<16x32xf32>
      %c0_15 = arith.constant 0 : index
      %c0_16 = arith.constant 0 : index
      %15 = vector.load %arg5[%c0_15, %c0_16] : memref<4x32xf32, #tpu.memory_space<vmem>>, vector<4x32xf32>
      %cst_17 = arith.constant dense<0.000000e+00> : vector<16x4xf32>
      %16 = tpu.matmul %14, %15, %cst_17 {dimension_numbers = #tpu.dot_dimension_numbers<[1], [1], [0], [0], [0, 0, 1, 0], [], []>} : vector<16x32xf32>, vector<4x32xf32>, vector<16x4xf32> -> vector<16x4xf32>
      %c0_18 = arith.constant 0 : index
      %c0_19 = arith.constant 0 : index
      %17 = vector.load %arg8[%c0_18, %c0_19] : memref<16x4xf32, #tpu.memory_space<vmem>>, vector<16x4xf32>
      tpu.vector_store %arg8[%c0_18, %c0_19], %16 {strides = array<i32>} : memref<16x4xf32, #tpu.memory_space<vmem>>, vector<16x4xf32>,
    } else {
    }
    %c0 = arith.constant 0 : index
    %c0_1 = arith.constant 0 : index
    %3 = vector.load %arg2[%c0, %c0_1] : memref<16x32xf32, #tpu.memory_space<vmem>>, vector<16x32xf32>
    %c0_2 = arith.constant 0 : index
    %c0_3 = arith.constant 0 : index
    %4 = vector.load %arg3[%c0_2, %c0_3] : memref<64x32xf32, #tpu.memory_space<vmem>>, vector<64x32xf32>
    %cst = arith.constant dense<0.000000e+00> : vector<16x64xf32>
    %5 = tpu.matmul %3, %4, %cst {dimension_numbers = #tpu.dot_dimension_numbers<[1], [1], [0], [0], [0, 0, 1, 0], [], []>} : vector<16x32xf32>, vector<64x32xf32>, vector<16x64xf32> -> vector<16x64xf32>
    %c0_4 = arith.constant 0 : index
    %c0_5 = arith.constant 0 : index
    %6 = vector.load %arg8[%c0_4, %c0_5] : memref<16x4xf32, #tpu.memory_space<vmem>>, vector<16x4xf32>
    %c0_6 = arith.constant 0 : index
    %c0_7 = arith.constant 0 : index
    %7 = vector.load %arg6[%c0_6, %c0_7] : memref<4x64xf32, #tpu.memory_space<vmem>>, vector<4x64xf32>
    %cst_8 = arith.constant dense<0.000000e+00> : vector<16x64xf32>
    %8 = tpu.matmul %6, %7, %cst_8 {dimension_numbers = #tpu.dot_dimension_numbers<[1], [0], [0], [1], [0, 0, 1, 1], [], []>} : vector<16x4xf32>, vector<4x64xf32>, vector<16x64xf32> -> vector<16x64xf32>
    %c0_9 = arith.constant 0 : index
    %c0_10 = arith.constant 0 : index
    %9 = vector.load %arg4[%c0_9, %c0_10] : memref<1x64xf32, #tpu.memory_space<vmem>>, vector<1x64xf32>
    %10 = vector.broadcast %9 : vector<1x64xf32> to vector<16x64xf32>
    %11 = arith.addf %5, %10 : vector<16x64xf32>
    %12 = arith.addf %11, %8 : vector<16x64xf32>
    %c0_11 = arith.constant 0 : index
    %c0_12 = arith.constant 0 : index
    %13 = vector.load %arg7[%c0_11, %c0_12] : memref<16x64xf32, #tpu.memory_space<vmem>>, vector<16x64xf32>
    tpu.vector_store %arg7[%c0_11, %c0_12], %12 {strides = array<i32>} : memref<16x64xf32, #tpu.memory_space<vmem>>, vector<16x64xf32>,
    return
  }
  func.func @transform_0(%arg0: i32, %arg1: i32) -> (i32, i32) {
    %c0_i32 = arith.constant 0 : i32
    %c0_i32_0 = arith.constant 0 : i32
    return %arg0, %c0_i32 : i32, i32
  }
  func.func @transform_1(%arg0: i32, %arg1: i32) -> (i32, i32) {
    %c0_i32 = arith.constant 0 : i32
    %c0_i32_0 = arith.constant 0 : i32
    return %arg1, %c0_i32 : i32, i32
  }
  func.func @transform_2(%arg0: i32, %arg1: i32) -> (i32, i32) {
    %c0_i32 = arith.constant 0 : i32
    %c0_i32_0 = arith.constant 0 : i32
    return %c0_i32, %arg1 : i32, i32
  }
  func.func @transform_3(%arg0: i32, %arg1: i32) -> (i32, i32) {
    %c0_i32 = arith.constant 0 : i32
    %c0_i32_0 = arith.constant 0 : i32
    %c0_i32_1 = arith.constant 0 : i32
    return %c0_i32, %c0_i32_0 : i32, i32
  }
  func.func @transform_4(%arg0: i32, %arg1: i32) -> (i32, i32) {
    %c0_i32 = arith.constant 0 : i32
    %c0_i32_0 = arith.constant 0 : i32
    return %c0_i32, %arg1 : i32, i32
  }
  func.func @transform_5(%arg0: i32, %arg1: i32) -> (i32, i32) {
    %c0_i32 = arith.constant 0 : i32
    return %arg0, %arg1 : i32, i32
  }
}

</mosaic_0001>

<bundles_post_ra>
// kernel: tpu_custom_call.1
= control target key start
LH: loop header
LB: loop body
LE: loop exit
PB: predicated region body
PF: predicated region fallthrough
CT: control target
= control target key end

     0   :  { %vm28_vm0 = vcmask 261120   ;;  %s578_s0 = inlined_call_operand.vmem [shape: f32[16,32], index: 0, kind: input, shape index: {}]   ;;  %s579_s1 = inlined_call_operand.vmem [shape: f32[64,32], index: 1, kind: input, shape index: {}]   ;;  %s580_s2 = inlined_call_operand.vmem [shape: f32[1,64], index: 2, kind: input, shape index: {}]   ;;  %s581_s3 = inlined_call_operand.vmem [shape: f32[4,32], index: 3, kind: input, shape index: {}]   ;;  %s582_s4 = inlined_call_operand.vmem [shape: f32[4,64], index: 4, kind: input, shape index: {}]   ;;  %s583_s5 = inlined_call_operand.hbm [shape: f32[16,64], index: 5, kind: output, shape index: {}]  }
   0x1   :  { %v27_v0 = vld [vmem:[%s581_s3] sm:$0xf]  ;;  %v119_v3 = vld [vmem:[%s579_s1 + $0x8] sm:$0xff]  ;;  %vm515_vm1 = vmpackc.low %vm28_vm0, %vm28_vm0 }
   0x2   :  { %v25_v1 = vld [vmem:[%s578_s0] sm:$0xff]  ;;  %382 = vmatprep.subr.msk.mxu0 %vm28_vm0, %v27_v0  ;;  %v26_v5 = vld [vmem:[%s578_s0 + $0x8] sm:$0xff]  ;;  %v120_v7 = vld [vmem:[%s579_s1 + $0x10] sm:$0xff] }
   0x3   :  { %384 = vmatprep.mubr.msk.f32.mxu0 %vm28_vm0, %v25_v1  ;;  %v118_v2 = vld [vmem:[%s579_s1] sm:$0xff]  ;;  %383 = vmatpush3.xpose.msk.msra.mxu0 %vm28_vm0, %v27_v0  ;;  %v121_v8 = vld [vmem:[%s579_s1 + $0x18] sm:$0xff] }
   0x4   :  { %v411_v6 = vpack.c.bf16 %v119_v3, %v118_v2  ;;  %408 = vmatprep.mubr.msk.f32.mxu1 %vm28_vm0, %v25_v1  ;;  %v417_v9 = vpack.c.bf16 %v121_v8, %v120_v7 }
   0x5   :  { %10 = vsyncpa [#allocation4], 0  ;;  %v122_v10 = vld [vmem:[%s579_s1 + $0x20] sm:$0xff]  ;;  %v123_v11 = vld [vmem:[%s579_s1 + $0x28] sm:$0xff]  ;;  %vm136_vm2 = vcmask 1043456   ;;  %vm113_vm3 = vcmask 31744  }
   0x6   :  { %413 = vmatprep.subr.msk.bf16.mxu1 %vm515_vm1, %v411_v6  ;;  %385 = vmatmul.mubr.msk.f32.vlgmr.msra.gmra.mrb[0].mxu0 %vm28_vm0, %v26_v5  ;;  %v423_v12 = vpack.c.bf16 %v123_v11, %v122_v10  ;;  %v124_v13 = vld [vmem:[%s579_s1 + $0x30] sm:$0xff]  ;;  %v125_v14 = vld [vmem:[%s579_s1 + $0x38] sm:$0xff]  ;;  %v128_v16 = vld [vmem:[%s582_s4] sm:$0xf]  ;;  %s466_s15 = smov [#allocation3]   ;;  %vm330_vm4 = vcmask 523264  }
   0x7   :  { %416 = vmatpush3.bf16.xpose.msk.msra.mxu1 %vm515_vm1, %v411_v6  ;;  %v429_v15 = vpack.c.bf16 %v125_v14, %v124_v13  ;;  %387 = vmatprep.subr.msk.mxu0 %vm136_vm2, %v128_v16  ;;  %v355_v24 = vld [vmem:[%s580_s2] ss:$0 sm:$0xff]  ;;  %s338_s16 = sshll.u32 %s466_s15, 4  ;;  %s339_s16 = int_to_ptr.vmem [resolvable:$true] %s338_s16 }
   0x8   :  { %419 = vmatprep.subr.msk.bf16.mxu1 %vm515_vm1, %v417_v9  ;;  %388 = vmatpush3.msk.msra.mxu0 %vm136_vm2, %v128_v16  ;;  %s442_s17 = scalar_lea.vmem %s339_s16, 256  ;;  %p447_p1 = scmp.lt.s32.totalorder %s339_s16, %s339_s16 }
   0x9   :  { %p443_p0 = scmp.ne.s32.totalorder %s339_s16, %s442_s17  ;;  %p448_p2 = scmp.lt.s32.totalorder %s442_s17, %s442_s17 }
   0xb   :  { %p449_p3 = por %p448_p2, %p447_p1 }
   0xd   :  { %p450_p4 = pnand %p449_p3, %p443_p0 }
   0xf   :  { %422 = vmatpush3.bf16.xpose.msk.msra.mxu1 %vm515_vm1, %v417_v9 }
  0x10   :  { %425 = vmatprep.subr.msk.bf16.mxu1 %vm515_vm1, %v423_v12 }
  0x17   :  { %428 = vmatpush3.bf16.xpose.msk.msra.mxu1 %vm515_vm1, %v423_v12 }
  0x18   :  { %431 = vmatprep.subr.msk.bf16.mxu1 %vm515_vm1, %v429_v15 }
  0x1f   :  { %434 = vmatpush3.bf16.xpose.msk.msra.mxu1 %vm515_vm1, %v429_v15 }
  0x26   :  { %409 = vmatmul.mubr.msk.f32.vlgmr.msra.gmra.mrb[0].mxu1 %vm28_vm0, %v26_v5 }
  0xd9   :  { %v386_v17 = vpop.f32.mrb[0].mxu0 }
  0xda   :  { %115 = vst.msk [vmem:[#allocation2 + $0x8] sm:$0xff] %vm113_vm3, %v386_v17  ;;  %v104_v18 = vpop.f32.mrb[1].mxu0 }
  0xdb   :  { %114 = vst.msk [vmem:[#allocation2] sm:$0xff] %vm113_vm3, %v104_v18 }
  0xe1   :  { %v127_v20 = vld [vmem:[#allocation2 + $0x8] sm:$0xff] }
  0xe2   :  { %v126_v19 = vld [vmem:[#allocation2] sm:$0xff] }
  0xe3   :  { %389 = vmatprep.mubr.msk.f32.mxu0 %vm113_vm3, %v126_v19 }
  0xe4   :  { %390 = vmatmul.mubr.msk.f32.vlgmr.msra.gmra.mrb[2].mxu0 %vm113_vm3, %v127_v20 }
  0xf9   :  { %v410_v21 = vpop.f32.mrb[0].mxu1 }
  0xfa   :  { %v319_v22 = vpop.f32.mrb[1].mxu1 }
 0x1b7   :  { %v391_v23 = vpop.f32.mrb[2].mxu0 }
 0x1b8   :  { %v435_v25 = vadd.f32 %v410_v21, %v391_v23  ;;  %v206_v26 = vpop.f32.mrb[3].mxu0 }
 0x1b9   :  { %v437_v27 = vadd.f32 %v319_v22, %v206_v26 }
 0x1ba   :  { %v436_v28 = vadd.f32 %v435_v25, %v355_v24 }
 0x1bb   :  { %v438_v29 = vadd.f32 %v437_v27, %v355_v24 }
 0x1bc   :  { %332 = vst.msk [vmem:[#allocation3 + $0x8] sm:$0xff] %vm330_vm4, %v436_v28 }
 0x1bd   :  { %331 = vst.msk [vmem:[#allocation3] sm:$0xff] %vm330_vm4, %v438_v29 }
 0x1be   :  { %453 = shalt.err (!%p450_p4)
}
 0x1bf   :  { %s454_s19 = scalar_lea.hbm %s583_s5, 256 }
 0x1c0   :  { %p455_p5 = scmp.ne.s32.totalorder %s583_s5, %s454_s19  ;;  %p458_p6 = scmp.lt.u32.totalorder %s454_s19, %s583_s5 }
 0x1c2   :  { %p460_p7 = pnand %p458_p6, %p455_p5 }
 0x1c4   :  { %463 = shalt.err (!%p460_p7)
}
 0x1c5   :  { %s467_s24 = smov 128   ;;  %s468_s25 = smov 8  }
 0x1c6   :  { %344 = dma.vmem_to_hbm [thread:$0]  %s339_s16, 256, %s583_s5, [#allocation4], %s467_s24, %s467_s24, %s468_s25  }
 0x1c7   :  { %464 = dma.done.wait [#allocation4], 256  }
 0x1c8   :  { %465 = vsyncadd [#allocation4], 4294967040 }
 0x1c9   :  { %348 = vsyncpa [#allocation4], 1 }

</bundles_post_ra>
